<compile_context>
chip_gen: v5e
topology: v5e:2x2
jax: 0.10.0
libtpu: 0.0.40
codegen_flags: <defaults>
</compile_context>

<pallas_src>
import jax
import jax.numpy as jnp
from jax.experimental import pallas as pl
from jax.experimental.pallas import tpu as pltpu


def _phase_matmul_kernel(x_ref, w_ref, b_ref, o_ref):
    # (16, C) @ (C, TS) -> (16, TS) on the MXU, f32 accumulation.
    acc = jnp.dot(w_ref[...], x_ref[...], preferred_element_type=jnp.float32)
    # bias is a scalar in SMEM; add in f32, single cast on store.
    o_ref[...] = (acc + b_ref[0]).astype(o_ref.dtype)


def _round_up(v, m):
    return ((v + m - 1) // m) * m


def _preferred_spatial_tile():
    """Generation-specific lane tile (elements along h*w).

    f32 double-buffered VMEM use ~= TS*256*4*2 (input) + TS*16*4*2 (output):
      v5e  (16 MiB default scoped):  TS=2048 ->  ~4.4 MiB
      v6e  (32 MiB default scoped):  TS=4096 ->  ~8.7 MiB
      v7x  (32 MiB default scoped):  TS=8192 -> ~17.3 MiB
    All within default scoped VMEM -> no vmem_limit_bytes override required.
    """
    try:
        kind = jax.devices()[0].device_kind.lower()
    except Exception:  # e.g. interpret mode / no device info
        kind = ""
    if "v7" in kind:
        return 8192
    if "v5e" in kind or "v5 lite" in kind or "v5litepod" in kind:
        return 2048
    return 4096


def regression_head_forward(x, cls, weight, bias):
    """JAX/Pallas equivalent of regression_head.forward.

    x:      (b, c, h, w) NCHW, c must be 256 so that c // 16 == 16
    cls:    4-tuple; cls[1] only feeds dead code in the torch module
    weight: (1, 16, 1, 1) conv weight
    bias:   (1,) conv bias
    returns (b, 1, 4h, 4w), same as the torch module.
    """
    del cls  # softmax/split on cls[1] never reaches the returned output
    b, c, h, w = x.shape
    g = c // 16          # conv in-channels (16 when c == 256)
    P = 16               # 4*4 pixel-shuffle phases
    assert weight.shape == (1, g, 1, 1), weight.shape
    assert g == 16 and c == 256, "Conv2d(16, 1, 1) requires c == 256"
    S = h * w

    # Block-structured weight: W_big[p, p*g + k] = w[k]   -> shape (16, c)
    w_flat = weight.reshape(g).astype(x.dtype)
    eye = jnp.eye(P, dtype=x.dtype)
    w_big = (eye[:, :, None] * w_flat[None, None, :]).reshape(P, c)

    bias_s = bias.reshape(1).astype(jnp.float32)   # scalar, lives in SMEM

    x2 = x.reshape(b, c, S)                        # free contiguous reshape

    # Always-tiled, lane-aligned spatial tiling.  The ragged last block is
    # clipped by Pallas: padded input lanes only affect output lanes that the
    # blocked out_spec never writes back (no reduction along lanes), so
    # numerics are unaffected and VMEM stays bounded for any image size.
    TS = min(_preferred_spatial_tile(), _round_up(S, 128))
    if b == 1 and S > 128 and pl.cdiv(S, TS) < 2:
        # Guarantee >= 2 steps on a "parallel" axis so both v7x TensorCores
        # get work (no-op on single-core v5e/v6e).
        TS = _round_up(pl.cdiv(S, 2), 128)
    n_s = pl.cdiv(S, TS)

    itemsize = jnp.dtype(x.dtype).itemsize
    cost = pl.CostEstimate(
        flops=2 * b * P * c * S,
        transcendentals=0,
        bytes_accessed=b * (c * S + P * S) * itemsize + P * c * itemsize,
    )

    out2 = pl.pallas_call(
        _phase_matmul_kernel,
        out_shape=jax.ShapeDtypeStruct((b, P, S), x.dtype),
        grid=(b, n_s),
        in_specs=[
            # per-(batch, spatial-tile) input block (c, TS)
            pl.BlockSpec((None, c, TS), lambda i, s: (i, 0, s)),
            # block-structured weight, resident in VMEM across the grid
            pl.BlockSpec((P, c), lambda i, s: (0, 0)),
            # bias scalar in SMEM
            pl.BlockSpec(memory_space=pltpu.MemorySpace.SMEM),
        ],
        out_specs=pl.BlockSpec((None, P, TS), lambda i, s: (i, 0, s)),
        compiler_params=pltpu.CompilerParams(
            dimension_semantics=("parallel", "parallel")),
        cost_estimate=cost,
    )(x2, w_big, bias_s)

    # Pixel shuffle on the 16x-smaller output: phase p = 4*i + j lands at
    # output pixel (4*y + i, 4*x + j).
    out = (out2.reshape(b, 4, 4, h, w)
               .transpose(0, 3, 1, 4, 2)
               .reshape(b, 1, 4 * h, 4 * w))
    return out


if __name__ == "__main__":
    key = jax.random.PRNGKey(0)
    kx, kc, kw, kb = jax.random.split(key, 4)

    # c must be 256 for the Conv2d(16, 1, 1) to apply after the rearrange
    b, c, h, w = 2, 256, 16, 16
    x = jax.random.normal(kx, (b, c, h, w), dtype=jnp.float32)

    # cls is a 4-tuple; only cls[1] is touched by the torch module (dead code)
    cls_prediction = jax.random.normal(kc, (b, 3, 4 * h, 4 * w), dtype=jnp.float32)
    cls = (None, cls_prediction, None, None)

    # deterministic Conv2d(16, 1, 1, 1, 0) parameters: weight (1,16,1,1), bias (1,)
    fan_in = 16
    bound = 1.0 / (fan_in ** 0.5)
    weight = jax.random.uniform(kw, (1, 16, 1, 1), jnp.float32, -bound, bound)
    bias = jax.random.uniform(kb, (1,), jnp.float32, -bound, bound)

    out = regression_head_forward(x, cls, weight, bias)
    out = jax.block_until_ready(out)

    # plain-JAX reference computed the original way (shuffle input, then conv)
    xs_ref = (x.reshape(b, 4, 4, c // 16, h, w)
               .transpose(0, 3, 4, 1, 5, 2)
               .reshape(b, c // 16, h * 4, w * 4))
    ref = jnp.einsum("bchw,oc->bohw", xs_ref, weight.reshape(1, 16)) \
          + bias.reshape(1, 1, 1, 1)

    assert out.shape == (b, 1, 4 * h, 4 * w), out.shape
    assert jnp.allclose(out, ref, atol=1e-5, rtol=1e-5)
    print("KERNEL_OK")
</pallas_src>

<mosaic_0001>
module attributes {stable_mosaic.version = 11 : i64} {
  func.func @_phase_matmul_kernel(%arg0: i32, %arg1: i32, %arg2: memref<1x256x256xf32, #tpu.memory_space<vmem>>, %arg3: memref<16x256xf32, #tpu.memory_space<vmem>>, %arg4: memref<1xf32, #tpu.memory_space<smem>>, %arg5: memref<1x16x256xf32, #tpu.memory_space<vmem>>) attributes {dimension_semantics = [#tpu.dimension_semantics<parallel>, #tpu.dimension_semantics<parallel>], iteration_bounds = array<i64: 2, 1>, scalar_prefetch = 0 : i64, scratch_operands = 0 : i64, tpu.core_type = #tpu.core_type<tc>, window_params = [{transform_indices = @transform_0, window_bounds = array<i64: 1, 256, 256>}, {pipeline_mode = #tpu.pipeline_mode<synchronous>, transform_indices = @transform_1, window_bounds = array<i64: 16, 256>}, {transform_indices = @transform_2, window_bounds = array<i64: 1>}, {transform_indices = @transform_3, window_bounds = array<i64: 1, 16, 256>}]} {
    %c0 = arith.constant 0 : index
    %c0_0 = arith.constant 0 : index
    %0 = vector.load %arg3[%c0, %c0_0] : memref<16x256xf32, #tpu.memory_space<vmem>>, vector<16x256xf32>
    %c0_1 = arith.constant 0 : index
    %c0_2 = arith.constant 0 : index
    %c0_3 = arith.constant 0 : index
    %1 = vector.load %arg2[%c0_1, %c0_2, %c0_3] : memref<1x256x256xf32, #tpu.memory_space<vmem>>, vector<1x256x256xf32>
    %2 = vector.shape_cast %1 : vector<1x256x256xf32> to vector<256x256xf32>
    %cst = arith.constant dense<0.000000e+00> : vector<16x256xf32>
    %3 = tpu.matmul %0, %2, %cst {dimension_numbers = #tpu.dot_dimension_numbers<[1], [0], [0], [1], [0, 0, 1, 1], [], []>} : vector<16x256xf32>, vector<256x256xf32>, vector<16x256xf32> -> vector<16x256xf32>
    %c0_4 = arith.constant 0 : index
    %4 = memref.load %arg4[%c0_4] : memref<1xf32, #tpu.memory_space<smem>>
    %5 = vector.broadcast %4 : f32 to vector<16x256xf32>
    %6 = arith.addf %3, %5 : vector<16x256xf32>
    %c0_5 = arith.constant 0 : index
    %c0_6 = arith.constant 0 : index
    %c0_7 = arith.constant 0 : index
    %7 = vector.load %arg5[%c0_5, %c0_6, %c0_7] : memref<1x16x256xf32, #tpu.memory_space<vmem>>, vector<1x16x256xf32>
    %8 = vector.shape_cast %7 : vector<1x16x256xf32> to vector<16x256xf32>
    %9 = vector.shape_cast %6 : vector<16x256xf32> to vector<1x16x256xf32>
    tpu.vector_store %arg5[%c0_5, %c0_6, %c0_7], %9 {strides = array<i32>} : memref<1x16x256xf32, #tpu.memory_space<vmem>>, vector<1x16x256xf32>,
    return
  }
  func.func @transform_0(%arg0: i32, %arg1: i32) -> (i32, i32, i32) {
    %c0_i32 = arith.constant 0 : i32
    %c0_i32_0 = arith.constant 0 : i32
    return %arg0, %c0_i32, %arg1 : i32, i32, i32
  }
  func.func @transform_1(%arg0: i32, %arg1: i32) -> (i32, i32) {
    %c0_i32 = arith.constant 0 : i32
    %c0_i32_0 = arith.constant 0 : i32
    %c0_i32_1 = arith.constant 0 : i32
    return %c0_i32, %c0_i32_0 : i32, i32
  }
  func.func @transform_2(%arg0: i32, %arg1: i32) -> i32 {
    %c0_i32 = arith.constant 0 : i32
    %c0_i32_0 = arith.constant 0 : i32
    return %c0_i32 : i32
  }
  func.func @transform_3(%arg0: i32, %arg1: i32) -> (i32, i32, i32) {
    %c0_i32 = arith.constant 0 : i32
    %c0_i32_0 = arith.constant 0 : i32
    return %arg0, %c0_i32, %arg1 : i32, i32, i32
  }
}

</mosaic_0001>

<bundles_post_ra>
// kernel: tpu_custom_call.1
= control target key start
LH: loop header
LB: loop body
LE: loop exit
PB: predicated region body
PF: predicated region fallthrough
CT: control target
= control target key end

     0   :  { %s1004_s0 = inlined_call_operand.hbm [shape: f32[2,256,256], index: 0, kind: input, shape index: {}]   ;;  %s1005_s1 = inlined_call_operand.hbm [shape: f32[16,256], index: 1, kind: input, shape index: {}]   ;;  %s1006_s2 = inlined_call_operand.<no memory space> [shape: f32[1], index: 2, kind: input, shape index: {}]   ;;  %s1007_s3 = inlined_call_operand.hbm [shape: f32[2,16,256], index: 3, kind: output, shape index: {}]  }
   0x1   :  { %8 = sst [smem:[#allocation2]] %s1006_s2 }
   0x2   :  { %9 = vsyncpa [#allocation4], 0 }
   0x3   :  { %11 = vsyncpa [#allocation4 + $0x1], 0 }
   0x4   :  { %12 = vsyncpa [#allocation7], 0 }
   0x5   :  { %13 = vsyncpa [#allocation5], 0 }
   0x6   :  { %15 = vsyncpa [#allocation5 + $0x1], 0  ;;  %s782_s14 = smov 0   ;;  %s784_s15 = smov 0  }
   0x7   :  { %s786_s16 = smov 0   ;;  %s788_s17 = smov 0  }
   0x8   :  { %s790_s18 = smov 0   ;;  %s792_s19 = smov 0  }
   0x9 LB: > { %s510_s2 = sadd.s32 4294967295, %s752_s19   ;;  %s511_s20 = sadd.s32 4294967294, %s752_s19   ;;  %s752_s19 = sphi %s792_s19, %s21_s19   ;;  %s748_s18 = sphi %s790_s18, %s1019_s18   ;;  %s744_s17 = sphi %s788_s17, %s1018_s17   ;;  %s740_s16 = sphi %s786_s16, %s1017_s16   ;;  %s736_s15 = sphi %s784_s15, %s1016_s15   ;;  %s732_s14 = sphi %s782_s14, %s1015_s14  }
   0xa   : > { %p55_p0 = scmp.ne.s32.totalorder %s736_s15, %s732_s14  ;;  %p816_p1 = scmp.eq.s32.totalorder %s510_s2, 0 }
   0xb   : > { %p820_p2 = scmp.eq.s32.totalorder %s510_s2, 1  ;;  %p129_p3 = scmp.eq.s32.totalorder %s511_s20, 1 }
   0xc   : > { %p826_p4 = por %p816_p1, %p55_p0  ;;  %p512_p5 = scmp.ge.s32.totalorder %s752_s19, 1 }
   0xd   : > { %p831_p6 = por %p129_p3, %p55_p0  ;;  %p136_p7 = scmp.lt.s32.totalorder %s752_s19, 3 }
   0xe   : > { %s147_s27 = sshll.u32 %s1005_s1, 4  ;;  %s754_s29 = smov [#allocation6]   ;;  %s148_s27 = int_to_ptr.hbm [resolvable:$true] %s147_s27 }
   0xf   : > { %p839_p8 = pnand %p512_p5, %p136_p7  ;;  %s149_s30 = sshll.u32 %s754_s29, 4  ;;  %s150_s30 = int_to_ptr.vmem [resolvable:$true] %s149_s30 }
  0x10   : > { %p514_p11 = scmp.ge.s32.totalorder %s752_s19, 2  ;;  %s755_s4 = smov 256  }
  0x11   : > { %p537_p9 = pneg %p839_p8  ;;  %s756_s5 = smov 16  }
  0x12   : > { %s33_s6 = sadd.s32 1, %s748_s18  ;;  %s42_s7 = sadd.s32 1, %s740_s16 }
  0x13   : > { %p538_p10 = pnand %p537_p9, %p816_p1  ;;  %p35_p12 = scmp.ge.s32.totalorder %s33_s6, 2 }
  0x14   : > { %p49_p13 = scmp.ne.s32.totalorder %s740_s16, %s736_s15  ;;  %p50_p0 = scmp.eq.s32.totalorder %s752_s19, 0 }
  0x15   : > { %540 = dma.hbm_to_vmem [thread:$0]  (!%p538_p10), %s148_s27, 512, %s150_s30, [#allocation7], %s755_s4, %s755_s4, %s756_s5  }
  0x16   : > { %s1021_s6 = smov (%p35_p12, %s33_s6), 0  ;;  %p858_p3 = por %p50_p0, %p49_p13 }
  0x17   : > { %p864_p5 = por %p820_p2, %p49_p13  ;;  %s37_s10 = ssub.s32 %s748_s18, %s1021_s6 }
  0x18   : > { %p550_p7 = scmp.lt.s32.totalorder %s752_s19, 2  ;;  %p40_p9 = scmp.eq.s32.totalorder %s37_s10, 0 }
  0x19   : > { %s166_s11 = sand.u32 1, %s740_s16   ;;  %s527_s2 = sshll.u32 %s748_s18, 9 }
  0x1a   : > { %s515_s12 = sshll.u32 %s166_s11, 9  ;;  %s177_s26 = scalar_lea.hbm %s1004_s0, %s527_s2 }
  0x1b   : > { %s873_s13 = scalar_select %p40_p9, %s740_s16, %s42_s7  }
  0x1c   : > { %s170_s27 = scalar_lea.vmem [#allocation3], %s515_s12  ;;  %s178_s22 = sshll.u32 %s177_s26, 4  ;;  %s179_s22 = int_to_ptr.hbm [resolvable:$true] %s178_s22 }
  0x1d   : > { %s180_s29 = sshll.u32 %s170_s27, 4  ;;  %p542_p2 = pnand %p550_p7, %p858_p3  ;;  %s181_s29 = int_to_ptr.vmem [resolvable:$true] %s180_s29 }
  0x1e   : > { %s167_s30 = scalar_lea.sflag [#allocation4], %s166_s11  ;;  %192 = sbr.rel (%p839_p8) target bundleno = 218 (0xda), region = 32 }
  0x1f   : > { %544 = dma.hbm_to_vmem [thread:$0]  (!%p542_p2), %s179_s22, 8192, %s181_s29, %s167_s30, %s755_s4, %s755_s4, %s756_s5  }
  0x20   : > { %s887_s7 = sand.u32 (!%p839_p8), 1, %s736_s15  }
  0x21   : > { %s519_s10 = sshll.u32 (!%p839_p8), %s887_s7, 9  ;;  %s195_s12 = scalar_lea.sflag (!%p839_p8), [#allocation4], %s887_s7 }
  0x22   : > { %s891_s2 = scalar_lea.vmem (!%p839_p8), [#allocation3], %s519_s10 }
  0x23   : > { %719 = dma.done.wait (%p826_p4), %s195_s12, 8192  }
  0x24   : > { %721 = vsyncadd (%p826_p4), %s195_s12, 4294959104 }
  0x25   : > { %723 = dma.done.wait (%p816_p1), [#allocation7], 512  }
  0x26   : > { %725 = vsyncadd (%p816_p1), [#allocation7], 4294966784  ;;  %v264_v0 = vld [vmem:[%s891_s2 + $0xf8] sm:$0xff]  ;;  %v262_v1 = vld [vmem:[%s891_s2 + $0xe8] sm:$0xff]  ;;  %s297_s21 = sld [smem:[#allocation2]]  ;;  %s521_s23 = sshll.u32 %s887_s7, 5 }
  0x27   : > { %v296_v2 = vld [vmem:[%s891_s2 + $0x1f8] sm:$0xff]  ;;  %345 = vmatpush.msra.mxu2 %v264_v0  ;;  %v294_v3 = vld [vmem:[%s891_s2 + $0x1e8] sm:$0xff]  ;;  %v263_v4 = vld [vmem:[%s891_s2 + $0xf0] sm:$0xff]  ;;  %s226_s28 = scalar_lea.vmem [#allocation8], %s521_s23  ;;  %s528_s4 = sshll.u32 %s744_s17, 5 }
  0x28   : > { %368 = vmatpush.msra.mxu3 %v296_v2  ;;  %v260_v5 = vld [vmem:[%s891_s2 + $0xd8] sm:$0xff]  ;;  %299 = vmatpush.msra.mxu0 %v263_v4  ;;  %v261_v7 = vld [vmem:[%s891_s2 + $0xe0] sm:$0xff]  ;;  %v258_v8 = vld [vmem:[%s891_s2 + $0xc8] sm:$0xff]  ;;  %s409_s11 = scalar_lea.hbm %s1007_s3, %s528_s4  ;;  %s410_s20 = sshll.u32 %s226_s28, 4  ;;  %s411_s20 = int_to_ptr.vmem [resolvable:$true] %s410_s20 }
  0x29   : > { %v292_v6 = vld [vmem:[%s891_s2 + $0x1d8] sm:$0xff]  ;;  %346 = vmatpush.msra.mxu2 %v262_v1  ;;  %v295_v9 = vld [vmem:[%s891_s2 + $0x1f0] sm:$0xff]  ;;  %v290_v10 = vld [vmem:[%s891_s2 + $0x1c8] sm:$0xff]  ;;  %s412_s25 = sshll.u32 %s409_s11, 4  ;;  %s396_s17 = scalar_lea.sflag [#allocation5], %s887_s7  ;;  %s413_s25 = int_to_ptr.hbm [resolvable:$true] %s412_s25 }
  0x2a   : > { %369 = vmatpush.msra.mxu3 %v294_v3  ;;  %300 = vmatpush.msra.mxu0 %v261_v7  ;;  %v259_v11 = vld [vmem:[%s891_s2 + $0xd0] sm:$0xff]  ;;  %v293_v12 = vld [vmem:[%s891_s2 + $0x1e0] sm:$0xff]  ;;  %v256_v15 = vld [vmem:[%s891_s2 + $0xb8] sm:$0xff]  ;;  %s680_s26 = sshra.s32 %s413_s25, 4  ;;  %s686_s30 = scalar_lea.hbm %s1007_s3, 64  ;;  %s681_s26 = int_to_ptr.hbm [resolvable:$true] %s680_s26 }
  0x2b   : > { %322 = vmatpush.msra.mxu1 %v295_v9  ;;  %347 = vmatpush.msra.mxu2 %v260_v5  ;;  %v257_v13 = vld [vmem:[%s891_s2 + $0xc0] sm:$0xff]  ;;  %v291_v14 = vld [vmem:[%s891_s2 + $0x1d0] sm:$0xff]  ;;  %v288_v16 = vld [vmem:[%s891_s2 + $0x1b8] sm:$0xff]  ;;  %s682_s27 = scalar_lea.hbm %s681_s26, 32  ;;  %p687_p10 = scmp.lt.s32.totalorder %s681_s26, %s1007_s3 }
  0x2c   : > { %370 = vmatpush.msra.mxu3 %v292_v6  ;;  %301 = vmatpush.msra.mxu0 %v259_v11  ;;  %v255_v17 = vld [vmem:[%s891_s2 + $0xb0] sm:$0xff]  ;;  %v289_v18 = vld [vmem:[%s891_s2 + $0x1c0] sm:$0xff]  ;;  %v254_v19 = vld [vmem:[%s891_s2 + $0xa8] sm:$0xff]  ;;  %v298_v4 = vstv %s297_s21  ;;  %p683_p1 = scmp.ne.s32.totalorder %s681_s26, %s682_s27  ;;  %p688_p12 = scmp.lt.s32.totalorder %s686_s30, %s682_s27 }
  0x2d   : > { %323 = vmatpush.msra.mxu1 %v293_v12  ;;  %348 = vmatpush.msra.mxu2 %v258_v8  ;;  %v286_v20 = vld [vmem:[%s891_s2 + $0x1a8] sm:$0xff]  ;;  %v253_v21 = vld [vmem:[%s891_s2 + $0xa0] sm:$0xff]  ;;  %v287_v22 = vld [vmem:[%s891_s2 + $0x1b0] sm:$0xff] }
  0x2e   : > { %371 = vmatpush.msra.mxu3 %v290_v10  ;;  %302 = vmatpush.msra.mxu0 %v257_v13  ;;  %v252_v23 = vld [vmem:[%s891_s2 + $0x98] sm:$0xff]  ;;  %v251_v25 = vld [vmem:[%s891_s2 + $0x90] sm:$0xff]  ;;  %v285_v26 = vld [vmem:[%s891_s2 + $0x1a0] sm:$0xff]  ;;  %p684_p4 = pnand %p683_p1, %p864_p5  ;;  %p689_p13 = por %p688_p12, %p687_p10 }
  0x2f   : > { %324 = vmatpush.msra.mxu1 %v291_v14  ;;  %349 = vmatpush.msra.mxu2 %v256_v15  ;;  %v284_v24 = vld [vmem:[%s891_s2 + $0x198] sm:$0xff]  ;;  %v250_v27 = vld [vmem:[%s891_s2 + $0x88] sm:$0xff]  ;;  %v249_v29 = vld [vmem:[%s891_s2 + $0x80] sm:$0xff] }
  0x30   : > { %372 = vmatpush.msra.mxu3 %v288_v16  ;;  %303 = vmatpush.msra.mxu0 %v255_v17  ;;  %v282_v28 = vld [vmem:[%s891_s2 + $0x188] sm:$0xff]  ;;  %v283_v30 = vld [vmem:[%s891_s2 + $0x190] sm:$0xff]  ;;  %v248_v31 = vld [vmem:[%s891_s2 + $0x78] sm:$0xff]  ;;  %p685_p8 = pneg %p684_p4 }
  0x31   : > { %325 = vmatpush.msra.mxu1 %v289_v18  ;;  %350 = vmatpush.msra.mxu2 %v254_v19  ;;  %v280_v32 = vld [vmem:[%s891_s2 + $0x178] sm:$0xff]  ;;  %v247_v33 = vld [vmem:[%s891_s2 + $0x70] sm:$0xff]  ;;  %v281_v34 = vld [vmem:[%s891_s2 + $0x180] sm:$0xff] }
  0x32   : > { %373 = vmatpush.msra.mxu3 %v286_v20  ;;  %304 = vmatpush.msra.mxu0 %v253_v21  ;;  %v246_v35 = vld [vmem:[%s891_s2 + $0x68] sm:$0xff]  ;;  %v245_v37 = vld [vmem:[%s891_s2 + $0x60] sm:$0xff]  ;;  %v279_v38 = vld [vmem:[%s891_s2 + $0x170] sm:$0xff]  ;;  %p690_p0 = pnand %p689_p13, %p685_p8 }
  0x33   : > { %326 = vmatpush.msra.mxu1 %v287_v22  ;;  %351 = vmatpush.msra.mxu2 %v252_v23  ;;  %v278_v36 = vld [vmem:[%s891_s2 + $0x168] sm:$0xff]  ;;  %v244_v39 = vld [vmem:[%s891_s2 + $0x58] sm:$0xff]  ;;  %v243_v41 = vld [vmem:[%s891_s2 + $0x50] sm:$0xff] }
  0x34   : > { %374 = vmatpush.msra.mxu3 %v284_v24  ;;  %305 = vmatpush.msra.mxu0 %v251_v25  ;;  %v276_v40 = vld [vmem:[%s891_s2 + $0x158] sm:$0xff]  ;;  %v277_v42 = vld [vmem:[%s891_s2 + $0x160] sm:$0xff]  ;;  %v242_v43 = vld [vmem:[%s891_s2 + $0x48] sm:$0xff] }
  0x35   : > { %327 = vmatpush.msra.mxu1 %v285_v26  ;;  %352 = vmatpush.msra.mxu2 %v250_v27  ;;  %v274_v44 = vld [vmem:[%s891_s2 + $0x148] sm:$0xff]  ;;  %v241_v45 = vld [vmem:[%s891_s2 + $0x40] sm:$0xff]  ;;  %v275_v46 = vld [vmem:[%s891_s2 + $0x150] sm:$0xff] }
  0x36   : > { %375 = vmatpush.msra.mxu3 %v282_v28  ;;  %306 = vmatpush.msra.mxu0 %v249_v29  ;;  %v240_v47 = vld [vmem:[%s891_s2 + $0x38] sm:$0xff]  ;;  %v239_v49 = vld [vmem:[%s891_s2 + $0x30] sm:$0xff]  ;;  %v273_v50 = vld [vmem:[%s891_s2 + $0x140] sm:$0xff] }
  0x37   : > { %328 = vmatpush.msra.mxu1 %v283_v30  ;;  %353 = vmatpush.msra.mxu2 %v248_v31  ;;  %v272_v48 = vld [vmem:[%s891_s2 + $0x138] sm:$0xff]  ;;  %v238_v51 = vld [vmem:[%s891_s2 + $0x28] sm:$0xff]  ;;  %v237_v53 = vld [vmem:[%s891_s2 + $0x20] sm:$0xff] }
  0x38   : > { %376 = vmatpush.msra.mxu3 %v280_v32  ;;  %307 = vmatpush.msra.mxu0 %v247_v33  ;;  %v270_v52 = vld [vmem:[%s891_s2 + $0x128] sm:$0xff]  ;;  %v271_v54 = vld [vmem:[%s891_s2 + $0x130] sm:$0xff]  ;;  %v236_v55 = vld [vmem:[%s891_s2 + $0x18] sm:$0xff] }
  0x39   : > { %329 = vmatpush.msra.mxu1 %v281_v34  ;;  %354 = vmatpush.msra.mxu2 %v246_v35  ;;  %v268_v56 = vld [vmem:[%s891_s2 + $0x118] sm:$0xff]  ;;  %v235_v57 = vld [vmem:[%s891_s2 + $0x10] sm:$0xff]  ;;  %v269_v58 = vld [vmem:[%s891_s2 + $0x120] sm:$0xff] }
  0x3a   : > { %377 = vmatpush.msra.mxu3 %v278_v36  ;;  %308 = vmatpush.msra.mxu0 %v245_v37  ;;  %v234_v59 = vld [vmem:[%s891_s2 + $0x8] sm:$0xff]  ;;  %v229_v61 = vld [vmem:[#allocation6] sm:$0xff]  ;;  %v267_v0 = vld [vmem:[%s891_s2 + $0x110] sm:$0xff] }
  0x3b   : > { %330 = vmatpush.msra.mxu1 %v279_v38  ;;  %355 = vmatpush.msra.mxu2 %v244_v39  ;;  %v266_v60 = vld [vmem:[%s891_s2 + $0x108] sm:$0xff]  ;;  %v233_v63 = vld [vmem:[%s891_s2] sm:$0xff]  ;;  %v231_v2 = vld [vmem:[#allocation6 + $0x10] sm:$0xff] }
  0x3c   : > { %378 = vmatpush.msra.mxu3 %v276_v40  ;;  %309 = vmatpush.msra.mxu0 %v243_v41  ;;  %v230_v62 = vld [vmem:[#allocation6 + $0x8] sm:$0xff]  ;;  %v265_v1 = vld [vmem:[%s891_s2 + $0x100] sm:$0xff]  ;;  %v232_v3 = vld [vmem:[#allocation6 + $0x18] sm:$0xff] }
  0x3d   : > { %331 = vmatpush.msra.mxu1 %v277_v42  ;;  %356 = vmatpush.msra.mxu2 %v242_v43 }
  0x3e   : > { %379 = vmatpush.msra.mxu3 %v274_v44  ;;  %310 = vmatpush.msra.mxu0 %v241_v45 }
  0x3f   : > { %332 = vmatpush.msra.mxu1 %v275_v46  ;;  %357 = vmatpush.msra.mxu2 %v240_v47 }
  0x40   : > { %380 = vmatpush.msra.mxu3 %v272_v48  ;;  %311 = vmatpush.msra.mxu0 %v239_v49 }
  0x41   : > { %333 = vmatpush.msra.mxu1 %v273_v50  ;;  %358 = vmatpush.msra.mxu2 %v238_v51 }
  0x42   : > { %381 = vmatpush.msra.mxu3 %v270_v52  ;;  %312 = vmatpush.msra.mxu0 %v237_v53 }
  0x43   : > { %334 = vmatpush.msra.mxu1 %v271_v54  ;;  %359 = vmatpush.msra.mxu2 %v236_v55 }
  0x44   : > { %382 = vmatpush.msra.mxu3 %v268_v56  ;;  %313 = vmatpush.msra.mxu0 %v235_v57 }
  0x45   : > { %335 = vmatpush.msra.mxu1 %v269_v58  ;;  %360 = vmatpush.msra.mxu2 %v234_v59 }
  0x46   : > { %383 = vmatpush.msra.mxu3 %v266_v60  ;;  %361 = vmatmul.f32.vlgmr.msra.gmra.mxu2 %v229_v61 }
  0x47   : > { %384 = vmatmul.f32.vlgmr.msra.gmra.mxu3 %v230_v62  ;;  %314 = vmatpush.msra.mxu0 %v233_v63 }
  0x48   : > { %336 = vmatpush.msra.mxu1 %v267_v0  ;;  %315 = vmatmul.f32.vlgmr.msra.gmra.mxu0 %v229_v61 }
  0x4a   : > { %337 = vmatpush.msra.mxu1 %v265_v1 }
  0x4b   : > { %338 = vmatmul.f32.vlgmr.msra.gmra.mxu1 %v230_v62 }
  0x4e   : > { %364 = vmatmul.f32.gmra.mxu2 %v231_v2 }
  0x4f   : > { %387 = vmatmul.f32.gmra.mxu3 %v232_v3 }
  0x50   : > { %318 = vmatmul.f32.gmra.mxu0 %v231_v2 }
  0x53   : > { %341 = vmatmul.f32.gmra.mxu1 %v232_v3 }
  0xc5   : > { %v316_v5 = vpop.f32.mrf.mxu0 }
  0xc6   : > { %v317_v6 = vadd.f32 %v316_v5, %v298_v4 }
  0xc8   : > { %v339_v7 = vpop.f32.mrf.mxu1 }
  0xc9   : > { %v340_v8 = vadd.f32 %v339_v7, %v317_v6  ;;  %v362_v9 = vpop.f32.mrf.mxu2 }
  0xca   : > { %v385_v10 = vpop.f32.mrf.mxu3  ;;  %v363_v11 = vadd.f32 %v362_v9, %v298_v4 }
  0xcb   : > { %391 = vst [vmem:[%s226_s28] sm:$0xff] %v340_v8 }
  0xcc   : > { %v386_v12 = vadd.f32 %v385_v10, %v363_v11 }
  0xcd   : > { %v319_v13 = vpop.f32.mrf.mxu0 }
  0xce   : > { %392 = vst [vmem:[%s226_s28 + $0x8] sm:$0xff] %v386_v12  ;;  %v320_v14 = vadd.f32 %v319_v13, %v298_v4 }
  0xd0   : > { %v342_v15 = vpop.f32.mrf.mxu1 }
  0xd1   : > { %v343_v16 = vadd.f32 %v342_v15, %v320_v14  ;;  %v365_v17 = vpop.f32.mrf.mxu2 }
  0xd2   : > { %v388_v18 = vpop.f32.mrf.mxu3  ;;  %v366_v19 = vadd.f32 %v365_v17, %v298_v4 }
  0xd3   : > { %393 = vst [vmem:[%s226_s28 + $0x10] sm:$0xff] %v343_v16 }
  0xd4   : > { %v389_v20 = vadd.f32 %v388_v18, %v366_v19 }
  0xd6   : > { %394 = vst [vmem:[%s226_s28 + $0x18] sm:$0xff] %v389_v20 }
  0xd7   : > { %693 = shalt.err (!%p690_p0)
}
  0xd8   : > { %s757_s7 = smov 256   ;;  %s758_s2 = smov 16  }
  0xd9   : > { %535 = dma.vmem_to_hbm [thread:$0]  (%p864_p5), %s411_s20, 512, %s413_s25, %s396_s17, %s757_s7, %s757_s7, %s758_s2  }
  0xda PF: > { %s427_s21 = sand.u32 1, %s732_s14   ;;  %p546_p3 = pnand %p514_p11, %p831_p6 }
  0xdb   : > { %s428_s23 = scalar_lea.sflag [#allocation5], %s427_s21 }
  0xdc   : > { %p547_p7 = pneg %p546_p3 }
  0xde   : > { %727 = dma.done.wait (%p547_p7), %s428_s23, 512  }
  0xdf   : > { %729 = vsyncadd (%p547_p7), %s428_s23, 4294966784  ;;  %s21_s19 = sadd.s32 1, %s752_s19   ;;  %s1015_s14 = smov %s736_s15 }
  0xe0   : > { %p18_p9 = scmp.ge.s32.totalorder %s21_s19, 4   ;;  %s1016_s15 = smov %s740_s16 }
  0xe1   : > { %s1017_s16 = smov %s873_s13  ;;  %s1018_s17 = smov %s748_s18 }
  0xe2   : > { %s1019_s18 = smov %s1021_s6  ;;  %20 = sbr.rel (!%p18_p9) target bundleno = 9 (0x9), region = 81 }
  0xe7   :  { %434 = vsyncpa [#allocation4], 1 }
  0xe8   :  { %436 = vsyncpa [#allocation4 + $0x1], 1 }
  0xe9   :  { %437 = vsyncpa [#allocation7], 1 }
  0xea   :  { %438 = vsyncpa [#allocation5], 1 }
  0xeb   :  { %440 = vsyncpa [#allocation5 + $0x1], 1 }

</bundles_post_ra>
